<compile_context>
chip_gen: v5e
topology: v5e:2x2
jax: 0.10.0
libtpu: 0.0.40
codegen_flags: <defaults>
</compile_context>

<pallas_src>
import functools

import jax
import jax.numpy as jnp
from jax.experimental import pallas as pl
from jax.experimental.pallas import tpu as pltpu


NUM_CLASSES = 5
LANE = 128      # class dim zero-padded to one full lane tile (unmasked vst)
K_TILE = 512    # K (input_size) chunk when input_size is large


def _round_up(n, m):
    return ((n + m - 1) // m) * m


def _vmem_capacity_bytes():
    """Physical VMEM of the current TPU generation (fallback: v7x's 64 MiB)."""
    try:
        return int(pltpu.get_tpu_info().vmem_capacity_bytes)
    except Exception:
        return 64 << 20


def _choose_k_tiling(d):
    """(tk, d_padded, nk): keep W fully resident for small D, K-tile large D."""
    if d <= K_TILE:
        return d, d, 1
    dp = _round_up(d, K_TILE)
    return K_TILE, dp, dp // K_TILE


def _plan_batch_tiling(batch, tk, nk, cp, cap):
    """Pick batch tile tb, padded batch bp, #batch tiles and vmem_limit_bytes.

    Accounting covers double-buffered f32 x tiles, the bf16 W tile
    (single-buffered when invariant), bias, the f32 accumulator scratch and
    the larger of the two output paths (bf16 logits vs per-row loss + labels).
    """
    budget = max(6 << 20, min(24 << 20, cap // 3))

    def tile_bytes(tb):
        x_b = 2 * tb * tk * 4                        # f32 x, double buffered
        w_b = (1 if nk == 1 else 2) * tk * cp * 2    # bf16 W
        bias_b = cp * 4                              # f32 bias, single buffer
        acc_b = tb * cp * 4                          # f32 accumulator scratch
        out_b = max(2 * tb * cp * 2,                 # bf16 logits, double buffered
                    2 * tb * 4 + 2 * tb * 4)         # per-row loss + int32 labels
        return x_b + w_b + bias_b + acc_b + out_b

    # Start at the HBM-roofline sweet spot (>=512 rows); shrink only if needed.
    tb = 2048 if cap >= (100 << 20) else 1024        # roomier on v5e/v6e, lean on v7x
    while tb > 128 and tile_bytes(tb) > budget:
        tb //= 2

    bp8 = _round_up(batch, 8)
    if bp8 <= tb:
        tb = bp8                                     # single tile, <= 7 padded rows
    else:
        # Cap batch-padding waste at ~15% of the real batch.
        while tb > 128 and (_round_up(batch, tb) - batch) > max(8, (3 * batch) // 20):
            tb //= 2
    bp = _round_up(batch, tb)

    vmem_limit = int(min(cap * 3 // 4, max(2 * tile_bytes(tb), 16 << 20)))
    return tb, bp, bp // tb, vmem_limit


def _spec(shape, index_map, *, single_buffer=False):
    """BlockSpec; invariant operands request a single VMEM buffer."""
    if single_buffer:
        try:
            return pl.BlockSpec(shape, index_map, pipeline_mode=pl.Buffered(1))
        except TypeError:   # older jax without pipeline_mode / Buffered
            pass
    return pl.BlockSpec(shape, index_map)


# ----------------------------------------------------------------------------
# Kernel 1: inference path  ->  logits = x @ W + b   (lane-dense, bf16 out)
# Grid = (batch tiles, K tiles); K is a reduction axis into the f32 scratch.
# ----------------------------------------------------------------------------
def _linear_kernel(x_ref, w_ref, b_ref, o_ref, acc_ref):
    k = pl.program_id(1)

    @pl.when(k == 0)
    def _():
        acc_ref[...] = jnp.zeros_like(acc_ref)

    acc_ref[...] += jnp.dot(
        x_ref[...].astype(jnp.bfloat16),   # VPU cast on the loaded f32 tile
        w_ref[...],
        preferred_element_type=jnp.float32,
    )

    @pl.when(k == pl.num_programs(1) - 1)
    def _():
        o_ref[...] = (acc_ref[...] + b_ref[...]).astype(o_ref.dtype)


# ----------------------------------------------------------------------------
# Kernel 2: training path -> per-row cross-entropy (wrapper does mean over B).
# Padded batch rows carry label -1 -> zero loss; padded class columns masked.
# ----------------------------------------------------------------------------
def _linear_ce_kernel(x_ref, w_ref, b_ref, y_ref, loss_ref, acc_ref, *, num_classes):
    k = pl.program_id(1)

    @pl.when(k == 0)
    def _():
        acc_ref[...] = jnp.zeros_like(acc_ref)

    acc_ref[...] += jnp.dot(
        x_ref[...].astype(jnp.bfloat16),
        w_ref[...],
        preferred_element_type=jnp.float32,
    )

    @pl.when(k == pl.num_programs(1) - 1)
    def _():
        logits = acc_ref[...] + b_ref[...]
        tb, cp = logits.shape
        classes = jax.lax.broadcasted_iota(jnp.int32, (tb, cp), 1)
        # Mask padded class columns so they do not affect the softmax.
        logits = jnp.where(classes < num_classes, logits, jnp.float32(-1e30))
        # Numerically stable log-softmax.
        m = jnp.max(logits, axis=-1, keepdims=True)
        lse = m + jnp.log(jnp.sum(jnp.exp(logits - m), axis=-1, keepdims=True))
        log_probs = logits - lse
        one_hot = (classes == y_ref[...]).astype(jnp.float32)   # y_ref is (tb, 1)
        loss_ref[...] = -jnp.sum(one_hot * log_probs, axis=-1, keepdims=True)


# ----------------------------------------------------------------------------
# Wrapper (plain JAX glue)
# ----------------------------------------------------------------------------
def init_params(key, input_size, num_classes=NUM_CLASSES):
    """Deterministic init mimicking nn.Linear default (uniform +-1/sqrt(in))."""
    kw, kb = jax.random.split(key)
    bound = 1.0 / float(input_size) ** 0.5
    # PyTorch weight is (out, in); store transposed (in, out) for the kernel.
    w_t = jax.random.uniform(kw, (input_size, num_classes), jnp.float32, -bound, bound)
    b = jax.random.uniform(kb, (1, num_classes), jnp.float32, -bound, bound)
    return w_t, b


def prepare_params(w_t, b):
    """One-time parameter prep (hoisted out of the per-step path):
    zero-pad W to (Dp, 128) and cast to bf16, zero-pad bias to (1, 128) f32."""
    d, c = w_t.shape
    cp = _round_up(c, LANE)
    _, dp, _ = _choose_k_tiling(d)
    w_pad = (jnp.zeros((dp, cp), jnp.float32).at[:d, :c].set(w_t)).astype(jnp.bfloat16)
    b_pad = jnp.zeros((1, cp), jnp.float32).at[:, :c].set(jnp.reshape(b, (1, c)))
    return w_pad, b_pad


def torch_model_forward(x, w_pad, b_pad, y=None, num_classes=NUM_CLASSES):
    """Matches TorchModel.forward: logits if y is None, else mean CE loss.
    w_pad / b_pad come from prepare_params()."""
    B, D = x.shape
    Dp, CP = w_pad.shape
    tk, _, nk = _choose_k_tiling(Dp)
    cap = _vmem_capacity_bytes()
    tb, bp, nb, vmem_limit = _plan_batch_tiling(B, tk, nk, CP, cap)

    # Only pads when the batch is ragged w.r.t. the tile or D needs K-padding.
    if bp != B or Dp != D:
        x = jnp.pad(x, ((0, bp - B), (0, Dp - D)))

    in_specs_common = [
        pl.BlockSpec((tb, tk), lambda i, k: (i, k)),                 # f32 x tiles
        _spec((tk, CP), lambda i, k: (k, 0), single_buffer=(nk == 1)),  # bf16 W
        _spec((1, CP), lambda i, k: (0, 0), single_buffer=True),     # f32 bias
    ]
    compiler_params = pltpu.CompilerParams(
        dimension_semantics=("parallel", "arbitrary"),
        vmem_limit_bytes=vmem_limit,
    )

    if y is None:
        logits_pad = pl.pallas_call(
            _linear_kernel,
            out_shape=jax.ShapeDtypeStruct((bp, CP), jnp.bfloat16),
            grid_spec=pl.GridSpec(
                grid=(nb, nk),
                in_specs=in_specs_common,
                out_specs=pl.BlockSpec((tb, CP), lambda i, k: (i, 0)),
                scratch_shapes=[pltpu.VMEM((tb, CP), jnp.float32)],
            ),
            compiler_params=compiler_params,
        )(x, w_pad, b_pad)
        return logits_pad[:B, :num_classes].astype(jnp.float32)

    # Training path: padded rows get label -1 (zero one-hot -> zero loss row).
    y2d = (jnp.full((bp, 1), -1, jnp.int32)
           .at[:B, 0].set(y.reshape(B).astype(jnp.int32)))
    per_row = pl.pallas_call(
        functools.partial(_linear_ce_kernel, num_classes=num_classes),
        out_shape=jax.ShapeDtypeStruct((bp, 1), jnp.float32),
        grid_spec=pl.GridSpec(
            grid=(nb, nk),
            in_specs=in_specs_common + [pl.BlockSpec((tb, 1), lambda i, k: (i, 0))],
            out_specs=pl.BlockSpec((tb, 1), lambda i, k: (i, 0)),
            scratch_shapes=[pltpu.VMEM((tb, CP), jnp.float32)],
        ),
        compiler_params=compiler_params,
    )(x, w_pad, b_pad, y2d)
    # Final mean in the wrapper: keeps the kernel batch-size agnostic and the
    # batch grid axis fully parallel (both TCs on v7x).
    return jnp.sum(per_row) / B


if __name__ == "__main__":
    key = jax.random.PRNGKey(0)

    def run_case(subkey, B, D, C=NUM_CLASSES):
        k_x, k_y, k_p = jax.random.split(subkey, 3)
        x = jax.random.normal(k_x, (B, D), jnp.float32)
        y = jax.random.randint(k_y, (B,), 0, C, jnp.int32)
        w_t, b = init_params(k_p, D, C)
        w_pad, b_pad = prepare_params(w_t, b)

        logits = torch_model_forward(x, w_pad, b_pad)            # inference path
        jax.block_until_ready(logits)
        loss = torch_model_forward(x, w_pad, b_pad, y)           # training path
        jax.block_until_ready(loss)

        # Pure-JAX reference (same bf16 matmul, f32 accumulation).
        ref_logits = jnp.dot(x.astype(jnp.bfloat16), w_t.astype(jnp.bfloat16),
                             preferred_element_type=jnp.float32) + b
        ref_logits_bf = ref_logits.astype(jnp.bfloat16).astype(jnp.float32)
        ref_lse = jax.scipy.special.logsumexp(ref_logits, axis=-1)
        ref_loss = jnp.mean(ref_lse - ref_logits[jnp.arange(B), y])

        assert logits.shape == (B, C)
        assert jnp.allclose(logits, ref_logits_bf, atol=1e-2, rtol=1e-2), \
            f"logits mismatch (B={B}, D={D})"
        assert jnp.allclose(loss, ref_loss, atol=1e-2, rtol=1e-2), \
            f"loss mismatch (B={B}, D={D})"

    k1, k2 = jax.random.split(key)
    run_case(k1, B=8, D=32)       # small case (single tile, no K tiling)
    run_case(k2, B=300, D=600)    # exercises batch padding + K-tiling path

    print("KERNEL_OK")
</pallas_src>

<mosaic_0001>
module attributes {stable_mosaic.version = 11 : i64} {
  func.func @_linear_kernel(%arg0: i32, %arg1: i32, %arg2: memref<8x32xf32, #tpu.memory_space<vmem>>, %arg3: memref<32x128xbf16, #tpu.memory_space<vmem>>, %arg4: memref<1x128xf32, #tpu.memory_space<vmem>>, %arg5: memref<8x128xbf16, #tpu.memory_space<vmem>>, %arg6: memref<8x128xf32, #tpu.memory_space<vmem>>) attributes {dimension_semantics = [#tpu.dimension_semantics<parallel>, #tpu.dimension_semantics<arbitrary>], iteration_bounds = array<i64: 1, 1>, scalar_prefetch = 0 : i64, scratch_operands = 1 : i64, tpu.core_type = #tpu.core_type<tc>, window_params = [{transform_indices = @transform_0, window_bounds = array<i64: 8, 32>}, {pipeline_mode = #tpu.pipeline_mode<synchronous>, transform_indices = @transform_1, window_bounds = array<i64: 32, 128>}, {pipeline_mode = #tpu.pipeline_mode<synchronous>, transform_indices = @transform_2, window_bounds = array<i64: 1, 128>}, {transform_indices = @transform_3, window_bounds = array<i64: 8, 128>}]} {
    %c0_i32 = arith.constant 0 : i32
    %0 = arith.cmpi eq, %arg1, %c0_i32 : i32
    %1 = arith.extui %0 : i1 to i32
    %c0_i32_0 = arith.constant 0 : i32
    %2 = arith.cmpi ne, %1, %c0_i32_0 : i32
    scf.if %2 {
      %cst_10 = arith.constant 0.000000e+00 : f32
      %13 = vector.broadcast %cst_10 : f32 to vector<8x128xf32>
      %c0_11 = arith.constant 0 : index
      %c0_12 = arith.constant 0 : index
      %14 = vector.load %arg6[%c0_11, %c0_12] : memref<8x128xf32, #tpu.memory_space<vmem>>, vector<8x128xf32>
      tpu.vector_store %arg6[%c0_11, %c0_12], %13 {strides = array<i32>} : memref<8x128xf32, #tpu.memory_space<vmem>>, vector<8x128xf32>,
    } else {
    }
    %c0 = arith.constant 0 : index
    %c0_1 = arith.constant 0 : index
    %3 = vector.load %arg6[%c0, %c0_1] : memref<8x128xf32, #tpu.memory_space<vmem>>, vector<8x128xf32>
    %c0_2 = arith.constant 0 : index
    %c0_3 = arith.constant 0 : index
    %4 = vector.load %arg2[%c0_2, %c0_3] : memref<8x32xf32, #tpu.memory_space<vmem>>, vector<8x32xf32>
    %5 = arith.truncf %4 : vector<8x32xf32> to vector<8x32xbf16>
    %c0_4 = arith.constant 0 : index
    %c0_5 = arith.constant 0 : index
    %6 = vector.load %arg3[%c0_4, %c0_5] : memref<32x128xbf16, #tpu.memory_space<vmem>>, vector<32x128xbf16>
    %cst = arith.constant dense<0.000000e+00> : vector<8x128xf32>
    %7 = tpu.matmul %5, %6, %cst {dimension_numbers = #tpu.dot_dimension_numbers<[1], [0], [0], [1], [0, 0, 1, 1], [], []>} : vector<8x32xbf16>, vector<32x128xbf16>, vector<8x128xf32> -> vector<8x128xf32>
    %8 = arith.addf %3, %7 : vector<8x128xf32>
    %c0_6 = arith.constant 0 : index
    %c0_7 = arith.constant 0 : index
    %9 = vector.load %arg6[%c0_6, %c0_7] : memref<8x128xf32, #tpu.memory_space<vmem>>, vector<8x128xf32>
    tpu.vector_store %arg6[%c0_6, %c0_7], %8 {strides = array<i32>} : memref<8x128xf32, #tpu.memory_space<vmem>>, vector<8x128xf32>,
    %c0_i32_8 = arith.constant 0 : i32
    %10 = arith.cmpi eq, %arg1, %c0_i32_8 : i32
    %11 = arith.extui %10 : i1 to i32
    %c0_i32_9 = arith.constant 0 : i32
    %12 = arith.cmpi ne, %11, %c0_i32_9 : i32
    scf.if %12 {
      %c0_10 = arith.constant 0 : index
      %c0_11 = arith.constant 0 : index
      %13 = vector.load %arg6[%c0_10, %c0_11] : memref<8x128xf32, #tpu.memory_space<vmem>>, vector<8x128xf32>
      %c0_12 = arith.constant 0 : index
      %c0_13 = arith.constant 0 : index
      %14 = vector.load %arg4[%c0_12, %c0_13] : memref<1x128xf32, #tpu.memory_space<vmem>>, vector<1x128xf32>
      %15 = vector.broadcast %14 : vector<1x128xf32> to vector<8x128xf32>
      %16 = arith.addf %13, %15 : vector<8x128xf32>
      %17 = arith.truncf %16 : vector<8x128xf32> to vector<8x128xbf16>
      %c0_14 = arith.constant 0 : index
      %c0_15 = arith.constant 0 : index
      %18 = vector.load %arg5[%c0_14, %c0_15] : memref<8x128xbf16, #tpu.memory_space<vmem>>, vector<8x128xbf16>
      tpu.vector_store %arg5[%c0_14, %c0_15], %17 {strides = array<i32>} : memref<8x128xbf16, #tpu.memory_space<vmem>>, vector<8x128xbf16>,
    } else {
    }
    return
  }
  func.func @transform_0(%arg0: i32, %arg1: i32) -> (i32, i32) {
    %c0_i32 = arith.constant 0 : i32
    return %arg0, %arg1 : i32, i32
  }
  func.func @transform_1(%arg0: i32, %arg1: i32) -> (i32, i32) {
    %c0_i32 = arith.constant 0 : i32
    %c0_i32_0 = arith.constant 0 : i32
    return %arg1, %c0_i32 : i32, i32
  }
  func.func @transform_2(%arg0: i32, %arg1: i32) -> (i32, i32) {
    %c0_i32 = arith.constant 0 : i32
    %c0_i32_0 = arith.constant 0 : i32
    %c0_i32_1 = arith.constant 0 : i32
    return %c0_i32, %c0_i32_0 : i32, i32
  }
  func.func @transform_3(%arg0: i32, %arg1: i32) -> (i32, i32) {
    %c0_i32 = arith.constant 0 : i32
    %c0_i32_0 = arith.constant 0 : i32
    return %arg0, %c0_i32 : i32, i32
  }
}

</mosaic_0001>

<bundles_post_ra>
// kernel: tpu_custom_call.1
= control target key start
LH: loop header
LB: loop body
LE: loop exit
PB: predicated region body
PF: predicated region fallthrough
CT: control target
= control target key end

     0   :  { %8 = vsyncpa [#allocation4], 0  ;;  %s250_s0 = inlined_call_operand.hbm [shape: f32[8,32], index: 0, kind: input, shape index: {}]   ;;  %s251_s1 = inlined_call_operand.hbm [shape: bf16[32,128], index: 1, kind: input, shape index: {}]   ;;  %s252_s2 = inlined_call_operand.vmem [shape: f32[1,128], index: 2, kind: input, shape index: {}]   ;;  %s253_s3 = inlined_call_operand.hbm [shape: bf16[8,128], index: 3, kind: output, shape index: {}]  }
   0x1   :  { %9 = vsyncpa [#allocation7], 0 }
   0x2   :  { %10 = vsyncpa [#allocation5], 0  ;;  %s16_s14 = sshll.u32 %s250_s0, 4  ;;  %s213_s15 = smov [#allocation3]   ;;  %s17_s14 = int_to_ptr.hbm [resolvable:$true] %s16_s14 }
   0x3   :  { %s18_s16 = sshll.u32 %s213_s15, 4  ;;  %s26_s19 = sshll.u32 %s251_s1, 4  ;;  %s19_s16 = int_to_ptr.vmem [resolvable:$true] %s18_s16  ;;  %s27_s19 = int_to_ptr.hbm [resolvable:$true] %s26_s19 }
   0x4   :  { %21 = dma.hbm_to_vmem [thread:$0]  %s17_s14, 128, %s19_s16, [#allocation4]  }
   0x5   :  { %s214_s20 = smov [#allocation6]   ;;  %s215_s22 = smov 64  }
   0x6   :  { %s28_s21 = sshll.u32 %s214_s20, 4  ;;  %s216_s23 = smov 4   ;;  %s29_s21 = int_to_ptr.vmem [resolvable:$true] %s28_s21 }
   0x7   :  { %34 = dma.hbm_to_vmem [thread:$0]  %s27_s19, 256, %s29_s21, [#allocation7], %s215_s22, %s215_s22, %s216_s23  }
   0x8   :  { %207 = dma.done.wait [#allocation4], 128  }
   0x9   :  { %208 = vsyncadd [#allocation4], 4294967168 }
   0xa   :  { %209 = dma.done.wait [#allocation7], 256  }
   0xb   :  { %210 = vsyncadd [#allocation7], 4294967040  ;;  %v128_v0 = vld [vmem:[#allocation6 + $0x8] sm:$0xff]  ;;  %v127_v1 = vld [vmem:[#allocation6] sm:$0xff]  ;;  %vm70_vm0 = vcmask 261120   ;;  %s217_s24 = smov [#allocation8]  }
   0xc   :  { %80 = vmatpush.bf16.msra.mxu0 %v128_v0  ;;  %v52_v2 = vld [vmem:[#allocation3] sm:$0xff]  ;;  %s105_s25 = sshll.u32 %s217_s24, 4  ;;  %s107_s28 = sshll.u32 %s253_s3, 4  ;;  %s106_s25 = int_to_ptr.vmem [resolvable:$true] %s105_s25  ;;  %s108_s28 = int_to_ptr.hbm [resolvable:$true] %s107_s28 }
   0xd   :  { %v53_v3 = vpack.c.bf16 %v52_v2, %v52_v2  ;;  %v134_v4 = vld [vmem:[%s252_s2] ss:$0 sm:$0xff] }
  0x10   :  { %81 = vmatpush.bf16.msra.mxu0 %v127_v1 }
  0x13   :  { %126 = vmatmul.msk.bf16.vlgmr.msra.gmra.mxu0 %vm70_vm0, %v53_v3 }
  0x90   :  { %v83_v5 = vpop.f32.mrf.mxu0 }
  0x91   :  { %v97_v6 = vadd.f32 %v134_v4, %v83_v5 }
  0x93   :  { %v98_v7 = vpack.c.bf16 %v97_v6, %v97_v6 }
  0x95   :  { %99 = vst [vmem:[#allocation8] sm:$0xf] %v98_v7 }
  0x96   :  { %110 = dma.vmem_to_hbm [thread:$0]  %s106_s25, 64, %s108_s28, [#allocation5]  }
  0x98   :  { %v85_v8 = vpop.f32.mrf.mxu0 }
  0x99   :  { %211 = dma.done.wait [#allocation5], 64  }
  0x9a   :  { %212 = vsyncadd [#allocation5], 4294967232 }
  0x9b   :  { %115 = vsyncpa [#allocation4], 1 }
  0x9c   :  { %116 = vsyncpa [#allocation7], 1 }
  0x9d   :  { %117 = vsyncpa [#allocation5], 1 }

</bundles_post_ra>
